<compile_context>
chip_gen: v7x
topology: tpu7x:2x2x1
jax: 0.10.0
libtpu: 0.0.40
codegen_flags: <defaults>
</compile_context>

<pallas_src>
import functools

import jax
import jax.numpy as jnp
from jax.experimental import pallas as pl
from jax.experimental.pallas import tpu as pltpu


def _soft_attention_kernel(*refs, bb, has_context, has_mask, reverse_attn, hm_resident):
    it = iter(refs)
    h_ref = next(it)                                   # (B_pad, D) resident  or (bb, D)
    proj_ref = next(it)                                # (bb, L, D)
    ctx_ref = next(it) if has_context else None        # (bb, L, Dc)
    mask_ref = next(it) if has_mask else None          # (B_pad, L) resident or (bb, L), int32
    wctx_ref = next(it)                                # (bb, Dc)
    attn_ref = next(it)                                # (bb, L)

    if hm_resident:
        start = pl.multiple_of(pl.program_id(0) * bb, bb)
        h_b = h_ref[pl.ds(start, bb), :]               # (bb, D), input dtype
        msk = mask_ref[pl.ds(start, bb), :] if has_mask else None
    else:
        h_b = h_ref[...]
        msk = mask_ref[...] if has_mask else None

    if reverse_attn:
        h_b = -h_b                                     # fold sign into h (tiny tensor)

    pc = proj_ref[...]                                 # (bb, L, D), input dtype

    # scores[b, l] = sum_d proj_context[b, l, d] * h[b, d]
    # Multiply in the input dtype (bf16 VALU on v6e/v7x), accumulate the lane reduce in f32.
    scores = jnp.sum(pc * h_b[:, None, :], axis=-1, dtype=jnp.float32)   # (bb, L) f32

    if has_mask:
        scores = jnp.where(msk == 0, jnp.float32(-jnp.inf), scores)

    # numerically stable softmax over L
    row_max = jnp.max(scores, axis=-1, keepdims=True)                    # (bb, 1)
    p = jnp.exp(scores - row_max)
    denom = jnp.sum(p, axis=-1, keepdims=True)
    w = p * pl.reciprocal(denom, approx=False)         # exact: denom is only (bb, 1)

    if has_mask:
        # Fully-masked rows produce NaN above; PyTorch zeroes them out explicitly.
        # Reuse row_max: a row is fully masked iff its max score is -inf (finite inputs).
        valid = row_max > jnp.float32(-jnp.inf)
        w = jnp.where(valid, w, jnp.float32(0.0))

    ctx = ctx_ref[...] if has_context else pc          # (bb, L, Dc), input dtype

    # weighted[b, :] = sum_l w[b, l] * ctx[b, l, :]  (VPU mul + sublane reduce, f32 accum)
    weighted = jnp.sum(ctx * w.astype(ctx.dtype)[:, :, None], axis=1, dtype=jnp.float32)

    attn_ref[...] = w.astype(attn_ref.dtype)
    wctx_ref[...] = weighted.astype(wctx_ref.dtype)


def _tpu_generation_params():
    """Per-step block budget / scoped VMEM limit / minimum grid steps, by TPU generation."""
    vmem_cap = None
    try:
        info = pltpu.get_tpu_info()
        vmem_cap = getattr(info, "vmem_capacity_bytes", None)
    except Exception:
        vmem_cap = None
    if vmem_cap is not None and vmem_cap > 96 * 1024 * 1024:
        # v5e / v6e: 128 MiB VMEM, single TensorCore -> big blocks, no multi-core constraint.
        return {"block_budget": 14 << 20, "vmem_limit": 64 << 20, "min_grid_steps": 1}
    # v7x-class (64 MiB VMEM, 2 TensorCores) or unknown: conservative blocks, keep 2 cores busy.
    return {"block_budget": 8 << 20, "vmem_limit": 32 << 20, "min_grid_steps": 2}


def soft_attention(h, proj_context, context=None, mask=None, reverse_attn=False):
    """h: (B, D), proj_context: (B, L, D), context: (B, L, Dc) or None,
    mask: (B, L) (nonzero = keep) or None.
    Returns (weighted_context (B, Dc), attn (B, L))."""
    h = jnp.asarray(h)
    proj_context = jnp.asarray(proj_context)
    B, L, D = proj_context.shape
    assert h.shape == (B, D), f"h shape {h.shape} incompatible with proj_context {proj_context.shape}"
    has_context = context is not None
    has_mask = mask is not None

    ctx_arr = jnp.asarray(context) if has_context else proj_context
    Dc = ctx_arr.shape[-1]
    attn_dtype = jnp.result_type(h.dtype, proj_context.dtype)
    out_dtype = jnp.result_type(attn_dtype, ctx_arr.dtype)

    gen = _tpu_generation_params()

    def itemsize(dt):
        return jnp.dtype(dt).itemsize

    f32 = 4
    # Per-batch-row footprint of one grid step, INCLUDING in-kernel f32 working temporaries.
    per_b = (
        D * (itemsize(h.dtype) + f32)                          # h block + f32 working copy
        + L * D * itemsize(proj_context.dtype)                 # proj_context block
        + L * D * f32                                          # product temp (conservative)
        + (L * Dc * (itemsize(ctx_arr.dtype) + f32) if has_context else 0)
        + (L * 4 if has_mask else 0)                           # int32 mask row
        + Dc * (itemsize(out_dtype) + f32)                     # output block + f32 accumulator
        + L * (itemsize(attn_dtype) + 4 * f32)                 # attn block + scores/p/w temps
    )

    # Batch tile: multiple of 8 (sublane rule for (bb, X) blocks), fitting the budget.
    bb_budget = max(8, (gen["block_budget"] // max(per_b, 1)) // 8 * 8)
    B8 = ((B + 7) // 8) * 8
    bb = min(bb_budget, B8)
    if gen["min_grid_steps"] >= 2 and B8 >= 16:
        # v7x: ensure the parallel grid has >= 2 steps so both TensorCores get work.
        bb = min(bb, max(8, (B8 // 2) // 8 * 8))
    B_pad = ((B + bb - 1) // bb) * bb
    grid = (B_pad // bb,)

    # Keep h / mask VMEM-resident (single DMA, constant block index) when they are small.
    h_bytes = B_pad * D * itemsize(h.dtype)
    mask_bytes = B_pad * L * 4 if has_mask else 0
    hm_resident = (h_bytes + mask_bytes) <= (2 << 20)

    def pad_batch(x, value=0):
        if B_pad == B:
            return x
        pad_width = [(0, B_pad - B)] + [(0, 0)] * (x.ndim - 1)
        return jnp.pad(x, pad_width, constant_values=value)

    h_p = pad_batch(h)
    proj_p = pad_batch(proj_context)
    inputs = [h_p, proj_p]
    if hm_resident:
        in_specs = [pl.BlockSpec((B_pad, D), lambda b: (0, 0))]
    else:
        in_specs = [pl.BlockSpec((bb, D), lambda b: (b, 0))]
    in_specs.append(pl.BlockSpec((bb, L, D), lambda b: (b, 0, 0)))
    if has_context:
        inputs.append(pad_batch(ctx_arr))
        in_specs.append(pl.BlockSpec((bb, L, Dc), lambda b: (b, 0, 0)))
    if has_mask:
        mask_i = (jnp.asarray(mask) != 0).astype(jnp.int32)
        inputs.append(pad_batch(mask_i))               # padded rows fully masked -> zero attn
        if hm_resident:
            in_specs.append(pl.BlockSpec((B_pad, L), lambda b: (0, 0)))
        else:
            in_specs.append(pl.BlockSpec((bb, L), lambda b: (b, 0)))

    cost = pl.CostEstimate(
        flops=2 * B_pad * L * D + 2 * B_pad * L * Dc + 5 * B_pad * L,
        transcendentals=B_pad * L,
        bytes_accessed=(
            B_pad * D * itemsize(h.dtype)
            + B_pad * L * D * itemsize(proj_context.dtype)
            + (B_pad * L * Dc * itemsize(ctx_arr.dtype) if has_context else 0)
            + (B_pad * L * 4 if has_mask else 0)
            + B_pad * Dc * itemsize(out_dtype)
            + B_pad * L * itemsize(attn_dtype)
        ),
    )

    kernel = functools.partial(
        _soft_attention_kernel,
        bb=bb, has_context=has_context, has_mask=has_mask,
        reverse_attn=bool(reverse_attn), hm_resident=hm_resident)

    wctx, attn = pl.pallas_call(
        kernel,
        out_shape=(jax.ShapeDtypeStruct((B_pad, Dc), out_dtype),
                   jax.ShapeDtypeStruct((B_pad, L), attn_dtype)),
        grid_spec=pltpu.PrefetchScalarGridSpec(
            num_scalar_prefetch=0,
            grid=grid,
            in_specs=in_specs,
            out_specs=[pl.BlockSpec((bb, Dc), lambda b: (b, 0)),
                       pl.BlockSpec((bb, L), lambda b: (b, 0))],
        ),
        compiler_params=pltpu.CompilerParams(
            dimension_semantics=("parallel",),
            vmem_limit_bytes=gen["vmem_limit"],
        ),
        cost_estimate=cost,
    )(*inputs)

    return wctx[:B], attn[:B]


def _reference(h, proj_context, context=None, mask=None, reverse_attn=False):
    attn = jnp.einsum("bld,bd->bl", proj_context, h)
    if reverse_attn:
        attn = -attn
    if mask is not None:
        attn = jnp.where(mask == 0, -jnp.inf, attn)
    w = jax.nn.softmax(attn, axis=-1)
    if mask is not None:
        valid = jnp.sum(mask, axis=-1, keepdims=True) > 0
        w = jnp.where(valid, w, 0.0)
    ctx = context if context is not None else proj_context
    weighted = jnp.einsum("bl,bld->bd", w, ctx)
    return weighted, w


if __name__ == "__main__":
    key = jax.random.PRNGKey(0)
    kh, kp, kc, km = jax.random.split(key, 4)

    B, L, D, Dc = 4, 8, 32, 32
    h = jax.random.normal(kh, (B, D), dtype=jnp.float32)
    proj_context = jax.random.normal(kp, (B, L, D), dtype=jnp.float32)
    context = jax.random.normal(kc, (B, L, Dc), dtype=jnp.float32)

    # mask: nonzero = keep; ensure every row has one valid entry, then fully mask row 1
    mask = (jax.random.uniform(km, (B, L)) > 0.3).astype(jnp.int32)
    mask = mask.at[:, 0].set(1)
    mask = mask.at[1, :].set(0)

    # masked + separate context (B=4 exercises the batch-padding path)
    out, attn = soft_attention(h, proj_context, context=context, mask=mask)
    jax.block_until_ready((out, attn))
    ref_out, ref_attn = _reference(h, proj_context, context=context, mask=mask)
    assert jnp.allclose(out, ref_out, atol=1e-5, rtol=1e-5), "weighted_context mismatch (masked)"
    assert jnp.allclose(attn, ref_attn, atol=1e-5, rtol=1e-5), "attn mismatch (masked)"
    assert bool(jnp.all(attn[1] == 0.0)), "fully-masked row should yield all-zero attention"

    # no mask, no separate context (falls back to proj_context), reverse_attn=True
    out2, attn2 = soft_attention(h, proj_context, reverse_attn=True)
    jax.block_until_ready((out2, attn2))
    ref_out2, ref_attn2 = _reference(h, proj_context, reverse_attn=True)
    assert jnp.allclose(out2, ref_out2, atol=1e-5, rtol=1e-5), "weighted_context mismatch (no mask)"
    assert jnp.allclose(attn2, ref_attn2, atol=1e-5, rtol=1e-5), "attn mismatch (no mask)"

    print("KERNEL_OK")
</pallas_src>

<mosaic_0001>
module attributes {stable_mosaic.version = 11 : i64} {
  func.func @_soft_attention_kernel(%arg0: i32, %arg1: memref<8x32xf32, #tpu.memory_space<vmem>>, %arg2: memref<8x8x32xf32, #tpu.memory_space<vmem>>, %arg3: memref<8x8x32xf32, #tpu.memory_space<vmem>>, %arg4: memref<8x8xi32, #tpu.memory_space<vmem>>, %arg5: memref<8x32xf32, #tpu.memory_space<vmem>>, %arg6: memref<8x8xf32, #tpu.memory_space<vmem>>) attributes {dimension_semantics = [#tpu.dimension_semantics<parallel>], iteration_bounds = array<i64: 1>, scalar_prefetch = 0 : i64, scratch_operands = 0 : i64, tpu.core_type = #tpu.core_type<tc>, window_params = [{pipeline_mode = #tpu.pipeline_mode<synchronous>, transform_indices = @transform_0, window_bounds = array<i64: 8, 32>}, {transform_indices = @transform_1, window_bounds = array<i64: 8, 8, 32>}, {transform_indices = @transform_2, window_bounds = array<i64: 8, 8, 32>}, {pipeline_mode = #tpu.pipeline_mode<synchronous>, transform_indices = @transform_3, window_bounds = array<i64: 8, 8>}, {transform_indices = @transform_4, window_bounds = array<i64: 8, 32>}, {transform_indices = @transform_5, window_bounds = array<i64: 8, 8>}]} {
    %c8_i32 = arith.constant 8 : i32
    %0 = arith.muli %arg0, %c8_i32 : i32
    %1 = tpu.assume_multiple %0, 8 : i32
    %2 = arith.index_cast %1 : i32 to index
    %c0 = arith.constant 0 : index
    %3 = vector.load %arg1[%2, %c0] : memref<8x32xf32, #tpu.memory_space<vmem>>, vector<8x32xf32>
    %4 = arith.index_cast %1 : i32 to index
    %c0_0 = arith.constant 0 : index
    %5 = vector.load %arg4[%4, %c0_0] : memref<8x8xi32, #tpu.memory_space<vmem>>, vector<8x8xi32>
    %c0_1 = arith.constant 0 : index
    %c0_2 = arith.constant 0 : index
    %c0_3 = arith.constant 0 : index
    %6 = vector.load %arg2[%c0_1, %c0_2, %c0_3] : memref<8x8x32xf32, #tpu.memory_space<vmem>>, vector<8x8x32xf32>
    %7 = vector.shape_cast %3 : vector<8x32xf32> to vector<8x1x32xf32>
    %8 = vector.broadcast %7 : vector<8x1x32xf32> to vector<8x8x32xf32>
    %9 = arith.mulf %6, %8 : vector<8x8x32xf32>
    %cst = arith.constant dense<0.000000e+00> : vector<8x8xf32>
    %10 = vector.multi_reduction <add>, %9, %cst [2] : vector<8x8x32xf32> to vector<8x8xf32>
    %c0_i32 = arith.constant 0 : i32
    %11 = vector.broadcast %c0_i32 : i32 to vector<8x8xi32>
    %12 = arith.cmpi eq, %5, %11 : vector<8x8xi32>
    %cst_4 = arith.constant 0xFF800000 : f32
    %13 = vector.broadcast %cst_4 : f32 to vector<8x8xf32>
    %14 = arith.select %12, %13, %10 : vector<8x8xi1>, vector<8x8xf32>
    %cst_5 = arith.constant dense<0xFF800000> : vector<8xf32>
    %15 = vector.multi_reduction <maximumf>, %14, %cst_5 [1] : vector<8x8xf32> to vector<8xf32>
    %16 = vector.shape_cast %15 : vector<8xf32> to vector<8x1xf32>
    %17 = vector.broadcast %16 : vector<8x1xf32> to vector<8x8xf32>
    %18 = arith.subf %14, %17 : vector<8x8xf32>
    %19 = math.exp %18 : vector<8x8xf32>
    %cst_6 = arith.constant dense<0.000000e+00> : vector<8xf32>
    %20 = vector.multi_reduction <add>, %19, %cst_6 [1] : vector<8x8xf32> to vector<8xf32>
    %21 = vector.shape_cast %20 : vector<8xf32> to vector<8x1xf32>
    %22 = tpu.reciprocal %21 : vector<8x1xf32> -> vector<8x1xf32>
    %23 = vector.broadcast %22 : vector<8x1xf32> to vector<8x8xf32>
    %24 = arith.mulf %19, %23 : vector<8x8xf32>
    %cst_7 = arith.constant 0xFF800000 : f32
    %25 = vector.broadcast %cst_7 : f32 to vector<8x1xf32>
    %26 = arith.cmpf ogt, %16, %25 : vector<8x1xf32>
    %cst_8 = arith.constant 0.000000e+00 : f32
    %27 = vector.shape_cast %26 : vector<8x1xi1> to vector<8x1xi1>
    %28 = vector.broadcast %27 : vector<8x1xi1> to vector<8x8xi1>
    %29 = vector.broadcast %cst_8 : f32 to vector<8x8xf32>
    %30 = arith.select %28, %24, %29 : vector<8x8xi1>, vector<8x8xf32>
    %c0_9 = arith.constant 0 : index
    %c0_10 = arith.constant 0 : index
    %c0_11 = arith.constant 0 : index
    %31 = vector.load %arg3[%c0_9, %c0_10, %c0_11] : memref<8x8x32xf32, #tpu.memory_space<vmem>>, vector<8x8x32xf32>
    %32 = vector.shape_cast %30 : vector<8x8xf32> to vector<8x8x1xf32>
    %33 = vector.broadcast %32 : vector<8x8x1xf32> to vector<8x8x32xf32>
    %34 = arith.mulf %31, %33 : vector<8x8x32xf32>
    %cst_12 = arith.constant dense<0.000000e+00> : vector<8x32xf32>
    %35 = vector.multi_reduction <add>, %34, %cst_12 [1] : vector<8x8x32xf32> to vector<8x32xf32>
    %c0_13 = arith.constant 0 : index
    %c0_14 = arith.constant 0 : index
    %36 = vector.load %arg6[%c0_13, %c0_14] : memref<8x8xf32, #tpu.memory_space<vmem>>, vector<8x8xf32>
    tpu.vector_store %arg6[%c0_13, %c0_14], %30 {strides = array<i32>} : memref<8x8xf32, #tpu.memory_space<vmem>>, vector<8x8xf32>,
    %c0_15 = arith.constant 0 : index
    %c0_16 = arith.constant 0 : index
    %37 = vector.load %arg5[%c0_15, %c0_16] : memref<8x32xf32, #tpu.memory_space<vmem>>, vector<8x32xf32>
    tpu.vector_store %arg5[%c0_15, %c0_16], %35 {strides = array<i32>} : memref<8x32xf32, #tpu.memory_space<vmem>>, vector<8x32xf32>,
    return
  }
  func.func @transform_0(%arg0: i32) -> (i32, i32) {
    %c0_i32 = arith.constant 0 : i32
    %c0_i32_0 = arith.constant 0 : i32
    %c0_i32_1 = arith.constant 0 : i32
    return %c0_i32, %c0_i32_0 : i32, i32
  }
  func.func @transform_1(%arg0: i32) -> (i32, i32, i32) {
    %c0_i32 = arith.constant 0 : i32
    %c0_i32_0 = arith.constant 0 : i32
    %c0_i32_1 = arith.constant 0 : i32
    return %arg0, %c0_i32, %c0_i32_0 : i32, i32, i32
  }
  func.func @transform_2(%arg0: i32) -> (i32, i32, i32) {
    %c0_i32 = arith.constant 0 : i32
    %c0_i32_0 = arith.constant 0 : i32
    %c0_i32_1 = arith.constant 0 : i32
    return %arg0, %c0_i32, %c0_i32_0 : i32, i32, i32
  }
  func.func @transform_3(%arg0: i32) -> (i32, i32) {
    %c0_i32 = arith.constant 0 : i32
    %c0_i32_0 = arith.constant 0 : i32
    %c0_i32_1 = arith.constant 0 : i32
    return %c0_i32, %c0_i32_0 : i32, i32
  }
  func.func @transform_4(%arg0: i32) -> (i32, i32) {
    %c0_i32 = arith.constant 0 : i32
    %c0_i32_0 = arith.constant 0 : i32
    return %arg0, %c0_i32 : i32, i32
  }
  func.func @transform_5(%arg0: i32) -> (i32, i32) {
    %c0_i32 = arith.constant 0 : i32
    %c0_i32_0 = arith.constant 0 : i32
    return %arg0, %c0_i32 : i32, i32
  }
}

</mosaic_0001>

<bundles_post_ra>
// kernel: tpu_custom_call.1
= control target key start
LH: loop header
LB: loop body
LE: loop exit
PB: predicated region body
PF: predicated region fallthrough
CT: control target
= control target key end

     0   :  { %11 = vsyncpa [#allocation3], 0  ;;  %s742_s0 = inlined_call_operand.hbm [shape: f32[8,32], index: 0, kind: input, shape index: {}]   ;;  %s743_s1 = inlined_call_operand.hbm [shape: f32[8,8,32], index: 1, kind: input, shape index: {}]   ;;  %s744_s2 = inlined_call_operand.hbm [shape: f32[8,8,32], index: 2, kind: input, shape index: {}]   ;;  %s745_s3 = inlined_call_operand.vmem [shape: s32[8,8], index: 3, kind: input, shape index: {}]   ;;  %s746_s4 = inlined_call_operand.hbm [shape: f32[8,32], index: 4, kind: output, shape index: {0}]   ;;  %s747_s5 = inlined_call_operand.hbm [shape: f32[8,8], index: 5, kind: output, shape index: {1}]  }
   0x1   :  { %12 = vsyncpa [#allocation6], 0 }
   0x2   :  { %13 = vsyncpa [#allocation4], 0 }
   0x3   :  { %14 = vsyncpa [#allocation10], 0  ;;  %s578_s18 = smov [#allocation5]   ;;  %s460_s22 = scalar_lea.hbm %s743_s1, 1024 }
   0x4   :  { %s30_s19 = sshll.u32 %s578_s18, 4  ;;  %p461_p0 = scmp.ne.s32.totalorder %s743_s1, %s460_s22  ;;  %s31_s19 = int_to_ptr.vmem [resolvable:$true] %s30_s19 }
   0x5   :  { %p464_p1 = scmp.lt.u32.totalorder %s460_s22, %s743_s1 }
   0x7   :  { %p466_p2 = pnand %p464_p1, %p461_p0 }
   0x9   :  { %469 = shalt.err (!%p466_p2)
}
   0xa   :  { %s470_s27 = scalar_lea.vmem %s31_s19, 1024  ;;  %p475_p4 = scmp.lt.s32.totalorder %s31_s19, %s31_s19 }
   0xb   :  { %p471_p3 = scmp.ne.s32.totalorder %s31_s19, %s470_s27  ;;  %p476_p5 = scmp.lt.s32.totalorder %s470_s27, %s470_s27 }
   0xd   :  { %p477_p6 = por %p476_p5, %p475_p4 }
   0xf   :  { %p478_p7 = pnand %p477_p6, %p471_p3 }
  0x11   :  { %481 = shalt.err (!%p478_p7)
}
  0x12   :  { %s579_s28 = smov 128   ;;  %s580_s29 = smov 8  }
  0x13   :  { %36 = dma.hbm_to_vmem [thread:$0]  %s743_s1, 1024, %s31_s19, [#allocation6], %s579_s28, %s579_s28, %s580_s29  }
  0x14   :  { %s581_s7 = smov [#allocation2]   ;;  %s582_s9 = smov [#allocation7]  }
  0x15   :  { %s21_s8 = sshll.u32 %s581_s7, 4  ;;  %s42_s10 = sshll.u32 %s582_s9, 4  ;;  %s22_s8 = int_to_ptr.vmem [resolvable:$true] %s21_s8  ;;  %s43_s10 = int_to_ptr.vmem [resolvable:$true] %s42_s10 }
  0x16   :  { %s482_s13 = scalar_lea.hbm %s742_s0, 128 }
  0x17   :  { %p483_p8 = scmp.ne.s32.totalorder %s742_s0, %s482_s13  ;;  %p486_p9 = scmp.lt.u32.totalorder %s482_s13, %s742_s0 }
  0x19   :  { %p488_p10 = pnand %p486_p9, %p483_p8 }
  0x1b   :  { %491 = shalt.err (!%p488_p10)
}
  0x1c   :  { %s492_s1 = scalar_lea.vmem %s22_s8, 128  ;;  %p497_p12 = scmp.lt.s32.totalorder %s22_s8, %s22_s8 }
  0x1d   :  { %p493_p11 = scmp.ne.s32.totalorder %s22_s8, %s492_s1  ;;  %p498_p13 = scmp.lt.s32.totalorder %s492_s1, %s492_s1 }
  0x1f   :  { %p499_p0 = por %p498_p13, %p497_p12 }
  0x21   :  { %p500_p1 = pnand %p499_p0, %p493_p11 }
  0x23   :  { %503 = shalt.err (!%p500_p1)
}
  0x24   :  { %24 = dma.hbm_to_vmem [thread:$0]  %s742_s0, 128, %s22_s8, [#allocation3]  }
  0x25   :  { %s504_s22 = scalar_lea.hbm %s744_s2, 1024 }
  0x26   :  { %p505_p2 = scmp.ne.s32.totalorder %s744_s2, %s504_s22  ;;  %p508_p3 = scmp.lt.u32.totalorder %s504_s22, %s744_s2 }
  0x28   :  { %p510_p4 = pnand %p508_p3, %p505_p2 }
  0x2a   :  { %513 = shalt.err (!%p510_p4)
}
  0x2b   :  { %s514_s27 = scalar_lea.vmem %s43_s10, 1024  ;;  %p519_p6 = scmp.lt.s32.totalorder %s43_s10, %s43_s10 }
  0x2c   :  { %p515_p5 = scmp.ne.s32.totalorder %s43_s10, %s514_s27  ;;  %p520_p7 = scmp.lt.s32.totalorder %s514_s27, %s514_s27 }
  0x2e   :  { %p521_p8 = por %p520_p7, %p519_p6 }
  0x30   :  { %p522_p9 = pnand %p521_p8, %p515_p5 }
  0x32   :  { %525 = shalt.err (!%p522_p9)
}
  0x33   :  { %48 = dma.hbm_to_vmem [thread:$0]  %s744_s2, 1024, %s43_s10, [#allocation6], %s579_s28, %s579_s28, %s580_s29  }
  0x34   :  { %570 = dma.done.wait [#allocation3], 128  }
  0x35   :  { %571 = vsyncadd [#allocation3], 4294967168 }
  0x36   :  { %572 = dma.done.wait [#allocation6], 2048  }
  0x37   :  { %573 = vsyncadd [#allocation6], 4294965248  ;;  %v78_v0 = vlaneseq  ;;  %v583_v1 = vmov 1966171168   ;;  %v62_v6 = vld [vmem:[#allocation2] sm:$0xff]  ;;  %v65_v13 = vld [vmem:[#allocation5] sm:$0xff] }
  0x38   :  { %v76_v2 = vunpack.c.l.s4 %v583_v1  ;;  %v74_v9 = vcombine.high %v62_v6, %v62_v6  ;;  %vm171_vm0 = vcmask 261120   ;;  %v67_v18 = vld [vmem:[#allocation5 + $0x10] sm:$0xff]  ;;  %v66_v19 = vld [vmem:[#allocation5 + $0x8] sm:$0xff]  ;;  %v69_v25 = vld [vmem:[#allocation5 + $0x20] sm:$0xff]  ;;  %vm239_vm1 = vcmask 1041409  }
  0x39   :  { %v658_v3 = vshrl.u32 %v78_v0, 7  ;;  %v68_v26 = vld [vmem:[#allocation5 + $0x18] sm:$0xff]  ;;  %v70_v35 = vld [vmem:[#allocation5 + $0x28] sm:$0xff]  ;;  %v71_v42 = vld [vmem:[#allocation5 + $0x30] sm:$0xff]  ;;  %v206_v53 = vand.u32 127, %v78_v0  ;;  %vm241_vm2 = vcmask 1042434  }
  0x3a   :  { %v77_v4 = vunpack.c.0.s8 %v76_v2  ;;  %v72_v46 = vld [vmem:[#allocation5 + $0x38] sm:$0xff]  ;;  %vm243_vm3 = vcmask 1043459   ;;  %vm245_vm4 = vcmask 1044484   ;;  %vm247_vm5 = vcmask 1045509  }
  0x3b   :  { %v662_v8 = vsub.s32 0, %v658_v3  ;;  %v209_v55 = vsub.s32 %v206_v53, %v658_v3  ;;  %vm249_vm6 = vcmask 1046534   ;;  %vm251_vm7 = vcmask 1047559  }
  0x3c   :  { %v80_v5 = vsub.s32 %v77_v4, %v658_v3  ;;  %vm255_vm9 = vcmask 64512  }
  0x3e   :  { %v81_v7 = vrot.slane %v62_v6, %v80_v5  ;;  %v88_v12 = vrot.slane %v74_v9, %v80_v5 }
  0x40   :  { %v97_v10 = vrot.slane %v81_v7, %v80_v5  ;;  %v89_v11 = vcombine.high %v81_v7, %v81_v7  ;;  %v104_v17 = vrot.slane %v88_v12, %v80_v5  ;;  %v90_v20 = vcombine.high %v88_v12, %v88_v12 }
  0x42   :  { %v126_v14 = vrot.slane %v97_v10, %v662_v8  ;;  %v119_v15 = vcombine.high %v97_v10, %v97_v10  ;;  %v111_v16 = vrot.slane %v89_v11, %v80_v5  ;;  %v142_v27 = vrot.slane %v104_v17, %v662_v8  ;;  %v64_v10 = vld [vmem:[%s745_s3] sm:$0xff]  ;;  %s584_s3 = smov [#allocation9]  }
  0x43   :  { %v118_v28 = vrot.slane %v90_v20, %v80_v5  ;;  %v120_v29 = vcombine.high %v104_v17, %v104_v17  ;;  %vm196_vm8 = vcmp.eq.s32.totalorder %v64_v10, 0  ;;  %s433_s29 = sshll.u32 %s584_s3, 4  ;;  %s434_s29 = int_to_ptr.vmem [resolvable:$true] %s433_s29 }
  0x44   :  { %v163_v21 = vmul.f32 %v126_v14, %v65_v13  ;;  %v134_v22 = vrot.slane %v119_v15, %v662_v8  ;;  %v130_v23 = vrot.slane %v111_v16, %v662_v8  ;;  %v121_v24 = vcombine.high %v111_v16, %v111_v16  ;;  %s526_s6 = scalar_lea.vmem %s434_s29, 128  ;;  %p531_p11 = scmp.lt.s32.totalorder %s434_s29, %s434_s29 }
  0x45   :  { %v167_v34 = vmul.f32 %v142_v27, %v69_v25  ;;  %v146_v36 = vrot.slane %v118_v28, %v662_v8  ;;  %v122_v37 = vcombine.high %v118_v28, %v118_v28  ;;  %v150_v41 = vrot.slane %v120_v29, %v662_v8  ;;  %p527_p10 = scmp.ne.s32.totalorder %s434_s29, %s526_s6  ;;  %p532_p12 = scmp.lt.s32.totalorder %s526_s6, %s526_s6 }
  0x46   :  { %v172_v30 = vsel %vm171_vm0, %v163_v21, 0.0  ;;  %v165_v31 = vmul.f32 %v134_v22, %v67_v18  ;;  %v164_v32 = vmul.f32 %v130_v23, %v66_v19  ;;  %v138_v33 = vrot.slane %v121_v24, %v662_v8 }
  0x47   :  { %173 = vadd.xlane.f32.xlu0 %v172_v30  ;;  %v168_v44 = vmul.f32 %v146_v36, %v70_v35  ;;  %v154_v45 = vrot.slane %v122_v37, %v662_v8  ;;  %v184_v47 = vsel %vm171_vm0, %v167_v34, 0.0  ;;  %v169_v48 = vmul.f32 %v150_v41, %v71_v42  ;;  %p533_p13 = por %p532_p12, %p531_p11 }
  0x48   :  { %v178_v38 = vsel %vm171_vm0, %v165_v31, 0.0  ;;  %v175_v39 = vsel %vm171_vm0, %v164_v32, 0.0  ;;  %v166_v40 = vmul.f32 %v138_v33, %v68_v26  ;;  %v288_v26 = vsub.s32 1, %v658_v3 }
  0x49   :  { %179 = vadd.xlane.f32.xlu1 %v178_v38  ;;  %v187_v49 = vsel %vm171_vm0, %v168_v44, 0.0  ;;  %v170_v50 = vmul.f32 %v154_v45, %v72_v46  ;;  %v190_v51 = vsel %vm171_vm0, %v169_v48, 0.0  ;;  %v295_v31 = vsub.s32 2, %v658_v3  ;;  %p534_p0 = pnand %p533_p13, %p527_p10 }
  0x4a   :  { %v181_v43 = vsel %vm171_vm0, %v166_v40, 0.0  ;;  %v309_v32 = vsub.s32 4, %v658_v3  ;;  %v302_v35 = vsub.s32 3, %v658_v3  ;;  %v323_v36 = vsub.s32 6, %v658_v3 }
  0x4b   :  { %176 = vadd.xlane.f32.xlu0 %v175_v39  ;;  %v193_v52 = vsel %vm171_vm0, %v170_v50, 0.0  ;;  %v316_v39 = vsub.s32 5, %v658_v3  ;;  %v330_v40 = vsub.s32 7, %v658_v3 }
  0x4d   :  { %182 = vadd.xlane.f32.xlu1 %v181_v43 }
  0x4f   :  { %185 = vadd.xlane.f32.xlu0 %v184_v47 }
  0x51   :  { %188 = vadd.xlane.f32.xlu1 %v187_v49 }
  0x53   :  { %191 = vadd.xlane.f32.xlu0 %v190_v51 }
  0x55   :  { %194 = vadd.xlane.f32.xlu1 %v193_v52 }
  0xd4   :  { %v174_v54 = vpop.xlane.xlu0 %173 }
  0xd5   :  { %v210_v58 = vrot.slane %v174_v54, %v209_v55 }
  0xd6   :  { %v180_v56 = vpop.xlane.xlu1 %179 }
  0xd7   :  { %v218_v60 = vrot.slane %v180_v56, %v209_v55 }
  0xd8   :  { %v177_v57 = vpop.xlane.xlu0 %176 }
  0xd9   :  { %v214_v59 = vrot.slane %v177_v57, %v209_v55 }
  0xda   :  { %v183_v61 = vpop.xlane.xlu1 %182 }
  0xdb   :  { %v240_v62 = vsel %vm239_vm1, %v214_v59, %v210_v58  ;;  %v222_v63 = vrot.slane %v183_v61, %v209_v55 }
  0xdc   :  { %v242_v1 = vsel %vm241_vm2, %v218_v60, %v240_v62  ;;  %v186_v2 = vpop.xlane.xlu0 %185 }
  0xdd   :  { %v244_v0 = vsel %vm243_vm3, %v222_v63, %v242_v1  ;;  %v226_v4 = vrot.slane %v186_v2, %v209_v55 }
  0xde   :  { %v189_v5 = vpop.xlane.xlu1 %188 }
  0xdf   :  { %v246_v6 = vsel %vm245_vm4, %v226_v4, %v244_v0  ;;  %v230_v7 = vrot.slane %v189_v5, %v209_v55 }
  0xe0   :  { %v192_v9 = vpop.xlane.xlu0 %191 }
  0xe1   :  { %v248_v11 = vsel %vm247_vm5, %v230_v7, %v246_v6  ;;  %v234_v12 = vrot.slane %v192_v9, %v209_v55 }
  0xe2   :  { %v195_v13 = vpop.xlane.xlu1 %194 }
  0xe3   :  { %v238_v14 = vrot.slane %v195_v13, %v209_v55  ;;  %v250_v15 = vsel %vm249_vm6, %v234_v12, %v248_v11 }
  0xe5   :  { %v252_v16 = vsel %vm251_vm7, %v238_v14, %v250_v15 }
  0xe6   :  { %v254_v17 = vsel %vm196_vm8, -inf, %v252_v16 }
  0xe7   :  { %v256_v18 = vsel %vm255_vm9, %v254_v17, -inf }
  0xe8   :  { %257 = vmax.xlane.f32.xlu0 %v256_v18 }
 0x175   :  { %v258_v19 = vpop.xlane.xlu0 %257 }
 0x176   :  { %v259_v20 = vsub.f32 %v254_v17, %v258_v19  ;;  %vm267_vm10 = vcmp.gt.f32.partialorder %v258_v19, -inf }
 0x178   :  { %v260_v21 = vmul.f32 1.442695, %v259_v20 }
 0x17a   :  { %456 = vpow2.f32 %v260_v21 }
 0x184   :  { %v457_v22 = vpop.eup %456 }
 0x185   :  { %v262_v23 = vsel %vm255_vm9, %v457_v22, 0.0 }
 0x186   :  { %263 = vadd.xlane.f32.xlu1 %v262_v23 }
 0x213   :  { %v264_v24 = vpop.xlane.xlu1 %263 }
 0x214   :  { %458 = vrcp.f32 %v264_v24 }
 0x21e   :  { %v459_v25 = vpop.eup %458 }
 0x21f   :  { %v266_v27 = vmul.f32 %v459_v25, %v457_v22 }
 0x221   :  { %v270_v28 = vsel %vm267_vm10, %v266_v27, 0.0 }
 0x222   :  { %399 = vst.msk [vmem:[#allocation9] sm:$0xff] %vm255_vm9, %v270_v28  ;;  %v289_v29 = vrot.slane %v270_v28, %v288_v26  ;;  %v282_v30 = vrot.slane %v270_v28, %v662_v8  ;;  %v296_v33 = vrot.slane %v270_v28, %v295_v31  ;;  %v310_v34 = vrot.slane %v270_v28, %v309_v32 }
 0x223   :  { %v303_v37 = vrot.slane %v270_v28, %v302_v35  ;;  %v324_v38 = vrot.slane %v270_v28, %v323_v36  ;;  %v317_v8 = vrot.slane %v270_v28, %v316_v39  ;;  %v331_v41 = vrot.slane %v270_v28, %v330_v40 }
 0x224   :  { %291 = vbcast.lane.b32.xlu1 %v289_v29, 256  ;;  %284 = vbcast.lane.b32.xlu0 %v282_v30, 256 }
 0x228   :  { %298 = vbcast.lane.b32.xlu1 %v296_v33, 256  ;;  %312 = vbcast.lane.b32.xlu0 %v310_v34, 256 }
 0x22c   :  { %305 = vbcast.lane.b32.xlu1 %v303_v37, 256  ;;  %326 = vbcast.lane.b32.xlu0 %v324_v38, 256 }
 0x230   :  { %319 = vbcast.lane.b32.xlu1 %v317_v8, 256 }
 0x234   :  { %333 = vbcast.lane.b32.xlu1 %v331_v41, 256 }
 0x235   :  { %537 = shalt.err (!%p534_p0)
}
 0x236   :  { %s538_s9 = scalar_lea.hbm %s747_s5, 128 }
 0x237   :  { %p539_p1 = scmp.ne.s32.totalorder %s747_s5, %s538_s9  ;;  %p542_p2 = scmp.lt.u32.totalorder %s538_s9, %s747_s5 }
 0x239   :  { %p544_p3 = pnand %p542_p2, %p539_p1 }
 0x23b   :  { %547 = shalt.err (!%p544_p3)
}
 0x23c   :  { %436 = dma.vmem_to_hbm [thread:$0]  %s434_s29, 128, %s747_s5, [#allocation10]   ;;  %v272_v3 = vld [vmem:[#allocation7 + $0x8] sm:$0xff]  ;;  %v271_v42 = vld [vmem:[#allocation7] sm:$0xff]  ;;  %v273_v47 = vld [vmem:[#allocation7 + $0x10] sm:$0xff] }
 0x23d   :  { %v275_v48 = vld [vmem:[#allocation7 + $0x20] sm:$0xff]  ;;  %v274_v59 = vld [vmem:[#allocation7 + $0x18] sm:$0xff]  ;;  %v277_v60 = vld [vmem:[#allocation7 + $0x30] sm:$0xff]  ;;  %s585_s5 = smov [#allocation8]  }
 0x23e   :  { %v276_v12 = vld [vmem:[#allocation7 + $0x28] sm:$0xff]  ;;  %v278_v24 = vld [vmem:[#allocation7 + $0x38] sm:$0xff]  ;;  %s423_s16 = sshll.u32 %s585_s5, 4  ;;  %s424_s16 = int_to_ptr.vmem [resolvable:$true] %s423_s16 }
 0x23f   :  { %s548_s17 = scalar_lea.vmem %s424_s16, 128  ;;  %p553_p5 = scmp.lt.s32.totalorder %s424_s16, %s424_s16 }
 0x240   :  { %p549_p4 = scmp.ne.s32.totalorder %s424_s16, %s548_s17  ;;  %p554_p6 = scmp.lt.s32.totalorder %s548_s17, %s548_s17 }
 0x242   :  { %p555_p7 = por %p554_p6, %p553_p5 }
 0x244   :  { %p556_p8 = pnand %p555_p7, %p549_p4 }
 0x296   :  { %v292_v43 = vpop.permute.xlu1 %291  ;;  %v285_v44 = vpop.permute.xlu0 %284 }
 0x297   :  { %v336_v45 = vmul.f32 %v292_v43, %v272_v3  ;;  %v335_v46 = vmul.f32 %v285_v44, %v271_v42 }
 0x299   :  { %v350_v49 = vsel %vm171_vm0, %v336_v45, 0.0  ;;  %v343_v50 = vsel %vm171_vm0, %v335_v46, 0.0 }
 0x29a   :  { %v351_v51 = vrot.slane %v350_v49, 4  ;;  %v344_v52 = vrot.slane %v343_v50, 4  ;;  %v299_v53 = vpop.permute.xlu1 %298  ;;  %v313_v54 = vpop.permute.xlu0 %312 }
 0x29b   :  { %v337_v55 = vmul.f32 %v299_v53, %v273_v47  ;;  %v339_v56 = vmul.f32 %v313_v54, %v275_v48 }
 0x29c   :  { %v352_v57 = vadd.f32 %v351_v51, %v350_v49  ;;  %v345_v58 = vadd.f32 %v344_v52, %v343_v50 }
 0x29d   :  { %v357_v61 = vsel %vm171_vm0, %v337_v55, 0.0  ;;  %v371_v62 = vsel %vm171_vm0, %v339_v56, 0.0 }
 0x29e   :  { %v353_v63 = vrot.slane %v352_v57, 2  ;;  %v346_v1 = vrot.slane %v345_v58, 2  ;;  %v358_v2 = vrot.slane %v357_v61, 4  ;;  %v372_v0 = vrot.slane %v371_v62, 4  ;;  %v306_v4 = vpop.permute.xlu1 %305  ;;  %v327_v5 = vpop.permute.xlu0 %326 }
 0x29f   :  { %v338_v6 = vmul.f32 %v306_v4, %v274_v59  ;;  %v341_v7 = vmul.f32 %v327_v5, %v277_v60 }
 0x2a0   :  { %v354_v9 = vadd.f32 %v353_v63, %v352_v57  ;;  %v359_v10 = vadd.f32 %v358_v2, %v357_v61  ;;  %v373_v11 = vadd.f32 %v372_v0, %v371_v62  ;;  %v347_v13 = vadd.f32 %v346_v1, %v345_v58 }
 0x2a1   :  { %v364_v14 = vsel %vm171_vm0, %v338_v6, 0.0  ;;  %v385_v15 = vsel %vm171_vm0, %v341_v7, 0.0 }
 0x2a2   :  { %v360_v16 = vrot.slane %v359_v10, 2  ;;  %v320_v17 = vpop.permute.xlu1 %319  ;;  %v374_v18 = vrot.slane %v373_v11, 2  ;;  %v365_v19 = vrot.slane %v364_v14, 4  ;;  %v386_v20 = vrot.slane %v385_v15, 4 }
 0x2a3   :  { %v340_v21 = vmul.f32 %v320_v17, %v276_v12  ;;  %v355_v22 = vrot.slane %v354_v9, 1  ;;  %v348_v25 = vrot.slane %v347_v13, 1 }
 0x2a4   :  { %v361_v23 = vadd.f32 %v360_v16, %v359_v10  ;;  %v366_v26 = vadd.f32 %v365_v19, %v364_v14  ;;  %v387_v27 = vadd.f32 %v386_v20, %v385_v15  ;;  %v375_v32 = vadd.f32 %v374_v18, %v373_v11 }
 0x2a5   :  { %v378_v28 = vsel %vm171_vm0, %v340_v21, 0.0  ;;  %v356_v37 = vadd.f32 %v355_v22, %v354_v9  ;;  %v349_v38 = vadd.f32 %v348_v25, %v347_v13 }
 0x2a6   :  { %v362_v29 = vrot.slane %v361_v23, 1  ;;  %v379_v30 = vrot.slane %v378_v28, 4  ;;  %v334_v31 = vpop.permute.xlu1 %333  ;;  %v367_v33 = vrot.slane %v366_v26, 2  ;;  %v388_v34 = vrot.slane %v387_v27, 2 }
 0x2a7   :  { %v342_v35 = vmul.f32 %v334_v31, %v278_v24  ;;  %v376_v42 = vrot.slane %v375_v32, 1  ;;  %v408_v47 = vsel %vm239_vm1, %v356_v37, %v349_v38 }
 0x2a8   :  { %v380_v36 = vadd.f32 %v379_v30, %v378_v28  ;;  %v368_v39 = vadd.f32 %v367_v33, %v366_v26  ;;  %v363_v40 = vadd.f32 %v362_v29, %v361_v23  ;;  %v389_v44 = vadd.f32 %v388_v34, %v387_v27 }
 0x2a9   :  { %v392_v8 = vsel %vm171_vm0, %v342_v35, 0.0  ;;  %v377_v52 = vadd.f32 %v376_v42, %v375_v32 }
 0x2aa   :  { %v381_v41 = vrot.slane %v380_v36, 2  ;;  %v393_v3 = vrot.slane %v392_v8, 4  ;;  %v369_v43 = vrot.slane %v368_v39, 1  ;;  %v409_v49 = vsel %vm241_vm2, %v363_v40, %v408_v47 }
 0x2ab   :  { %v390_v54 = vrot.slane %v389_v44, 1 }
 0x2ac   :  { %v382_v45 = vadd.f32 %v381_v41, %v380_v36  ;;  %v394_v46 = vadd.f32 %v393_v3, %v392_v8  ;;  %v370_v48 = vadd.f32 %v369_v43, %v368_v39 }
 0x2ad   :  { %v391_v60 = vadd.f32 %v390_v54, %v389_v44 }
 0x2ae   :  { %v383_v50 = vrot.slane %v382_v45, 1  ;;  %v395_v51 = vrot.slane %v394_v46, 2  ;;  %v410_v53 = vsel %vm243_vm3, %v370_v48, %v409_v49 }
 0x2af   :  { %v411_v57 = vsel %vm245_vm4, %v377_v52, %v410_v53 }
 0x2b0   :  { %v384_v55 = vadd.f32 %v383_v50, %v382_v45  ;;  %v396_v56 = vadd.f32 %v395_v51, %v394_v46 }
 0x2b2   :  { %v397_v58 = vrot.slane %v396_v56, 1  ;;  %v412_v59 = vsel %vm247_vm5, %v384_v55, %v411_v57 }
 0x2b3   :  { %v413_v62 = vsel %vm249_vm6, %v391_v60, %v412_v59 }
 0x2b4   :  { %v398_v61 = vadd.f32 %v397_v58, %v396_v56 }
 0x2b6   :  { %v414_v63 = vsel %vm251_vm7, %v398_v61, %v413_v62 }
 0x2b7   :  { %416 = vst.msk [vmem:[#allocation8] sm:$0xff] %vm171_vm0, %v414_v63 }
 0x2b8   :  { %559 = shalt.err (!%p556_p8)
}
 0x2b9   :  { %s560_s19 = scalar_lea.hbm %s746_s4, 128 }
 0x2ba   :  { %p561_p9 = scmp.ne.s32.totalorder %s746_s4, %s560_s19  ;;  %p564_p10 = scmp.lt.u32.totalorder %s560_s19, %s746_s4 }
 0x2bc   :  { %p566_p11 = pnand %p564_p10, %p561_p9 }
 0x2be   :  { %569 = shalt.err (!%p566_p11)
}
 0x2bf   :  { %426 = dma.vmem_to_hbm [thread:$0]  %s424_s16, 128, %s746_s4, [#allocation4]  }
 0x2c0   :  { %574 = dma.done.wait [#allocation4], 128  }
 0x2c1   :  { %575 = vsyncadd [#allocation4], 4294967168 }
 0x2c2   :  { %576 = dma.done.wait [#allocation10], 128  }
 0x2c3   :  { %577 = vsyncadd [#allocation10], 4294967168 }
 0x2c4   :  { %443 = vsyncpa [#allocation3], 1 }
 0x2c5   :  { %444 = vsyncpa [#allocation6], 1 }
 0x2c6   :  { %445 = vsyncpa [#allocation4], 1 }
 0x2c7   :  { %446 = vsyncpa [#allocation10], 1 }

</bundles_post_ra>
